<compile_context>
chip_gen: v7x
topology: tpu7x:2x2x1
jax: 0.10.0
libtpu: 0.0.40
codegen_flags: <defaults>
</compile_context>

<pallas_src>
from functools import partial

import numpy as np
import jax
import jax.numpy as jnp
from jax import lax
from jax.experimental import pallas as pl
from jax.experimental.pallas import tpu as pltpu

_DILATIONS = (6, 12, 18)


def _sum_all(a):
    # Full (1, 1) reduction kept 2-D for Mosaic friendliness.
    return jnp.sum(jnp.sum(a, axis=1, keepdims=True), axis=0, keepdims=True)


def _gn_normalize(y, groups, eps):
    """GroupNorm statistics + normalization only (no affine). y: (C, L) f32.

    Two-pass (mean, then centered variance) on static per-group channel slices:
    every element is reduced exactly once per pass, no masks / selects.
    """
    c, l = y.shape
    cpg = c // groups
    inv_n = 1.0 / float(cpg * l)
    if groups == 1:
        m = _sum_all(y) * inv_n
        d = y - m
        v = _sum_all(d * d) * inv_n
        return d * lax.rsqrt(v + eps)
    parts = []
    for g in range(groups):
        yg = y[g * cpg:(g + 1) * cpg, :]
        m = _sum_all(yg) * inv_n
        d = yg - m
        v = _sum_all(d * d) * inv_n
        parts.append(d * lax.rsqrt(v + eps))
    return jnp.concatenate(parts, axis=0)


def _aspp_kernel(x_ref, xt_ref, wa_ref, wd_ref, wo_ref, cols_ref, out_ref, *,
                 tap_counts, c_in, c_out, hw, eps, stacked):
    xf = x_ref[0]            # (c_in, hw)        bf16
    xt = xt_ref[0]           # (T*c_in, hw)      bf16 non-center dilated taps
    wa = wa_ref[...]         # (5*c_out, c_in)   bf16 [conv1 | conv5 | centers 2/3/4]
    wd = wd_ref[...]         # bf16 block-diag (3*c_out, T*c_in) or flat (c_out, T*c_in)
    wo = wo_ref[...]         # (c_out, 5*c_out)  bf16, branch GN gammas folded in
    cols = cols_ref[...]     # (c_out, 3) f32: [sum_k W_k@beta_k | ln_out gamma | ln_out beta]

    # conv1, conv5 and the three 3x3 center taps in one stacked MXU matmul
    # (single-pass bf16 operands, f32 accumulation).
    ya = jnp.dot(wa, xf, preferred_element_type=jnp.float32)           # (5*c_out, hw)
    b1 = ya[0:c_out]
    # AdaptiveAvgPool2d(1) commutes with the 1x1 conv5 -> lane mean of its rows.
    v5 = jnp.sum(ya[c_out:2 * c_out], axis=1, keepdims=True) * (1.0 / float(hw))
    centers = [ya[(2 + r) * c_out:(3 + r) * c_out] for r in range(3)]

    # Dilated 3x3 branches over their non-center taps.
    if stacked:
        # Small K per branch: one block-diagonal matmul amortizes MXU fill/drain.
        yd = jnp.dot(wd, xt, preferred_element_type=jnp.float32)       # (3*c_out, hw)
        branches = [centers[r] + yd[r * c_out:(r + 1) * c_out] for r in range(3)]
    else:
        branches = []
        off = 0
        for r, lr in enumerate(tap_counts):
            if lr == 0:
                branches.append(centers[r])
            else:
                c0, c1 = off * c_in, (off + lr) * c_in
                branches.append(centers[r] +
                                jnp.dot(wd[:, c0:c1], xt[c0:c1, :],
                                        preferred_element_type=jnp.float32))
            off += lr

    # Per-branch GroupNorm(2): statistics only (affine folded into wo / cols).
    z1 = _gn_normalize(b1, 2, eps)
    z2 = _gn_normalize(branches[0], 2, eps)
    z3 = _gn_normalize(branches[1], 2, eps)
    z4 = _gn_normalize(branches[2], 2, eps)
    z5 = _gn_normalize(v5, 2, eps)                                      # (c_out, 1)

    # conv_out over the channel concat: one fused matmul for branches 1..4 plus
    # two broadcast (c_out, 1) columns.  Bilinear upsampling (align_corners=True)
    # of the 1x1 branch-5 map is an exact constant broadcast, so its term never
    # materializes at (c_out, hw).
    z_cat = jnp.concatenate([z1, z2, z3, z4], axis=0).astype(jnp.bfloat16)
    out = jnp.dot(wo[:, 0:4 * c_out], z_cat, preferred_element_type=jnp.float32)
    col5 = jnp.dot(wo[:, 4 * c_out:5 * c_out].astype(jnp.float32), z5,
                   preferred_element_type=jnp.float32)
    out = out + (col5 + cols[:, 0:1])

    # ln_out: GroupNorm(1, C), affine applied in-kernel.
    out = _gn_normalize(out, 1, eps) * cols[:, 1:2] + cols[:, 2:3]
    out_ref[0] = out.astype(out_ref.dtype)


def aspp_forward(x, params, *, eps=1e-5):
    n, c_in, height, width = x.shape
    c_out = params["w1"].shape[0]
    hw = height * width
    # Lane-dense layout: keep H*W a multiple of 128 so output stores stay
    # unmasked.  TODO(synk): pad hw and mask the GN statistics for ragged sizes.
    if hw % 128 != 0:
        raise ValueError(f"H*W={hw} must be a multiple of 128")

    cdt = jnp.bfloat16          # MXU operand dtype; accumulation is f32 in-kernel
    dil_w = (params["w2"], params["w3"], params["w4"])

    # Live NON-CENTER taps of the dilated 3x3 convs (offsets outside the feature
    # map contribute zero and are dropped; the three center taps are
    # deduplicated into the stacked 1x1 matmul).
    taps = []
    for r, d in enumerate(_DILATIONS):
        for ky in range(3):
            for kx in range(3):
                oy, ox = (ky - 1) * d, (kx - 1) * d
                if (oy, ox) != (0, 0) and abs(oy) < height and abs(ox) < width:
                    taps.append((r, oy, ox))
    tap_counts = tuple(sum(1 for t in taps if t[0] == r) for r in range(3))
    t_total = len(taps)
    # Small per-branch contraction -> one block-diagonal matmul in the kernel.
    stacked = (max(tap_counts) * c_in < 128) if t_total else True

    # ------------- host/XLA-side constant packing & im2col (layout plumbing) -------------
    w_a = jnp.concatenate(
        [params["w1"].reshape(c_out, c_in), params["w5"].reshape(c_out, c_in)]
        + [dil_w[r][:, :, 1, 1] for r in range(3)], axis=0).astype(cdt)   # (5*c_out, c_in)

    def tap_w(r, oy, ox):
        d = _DILATIONS[r]
        return dil_w[r][:, :, oy // d + 1, ox // d + 1]                   # (c_out, c_in)

    if t_total:
        if stacked:
            rows = []
            for rb in range(3):
                blocks = [tap_w(r, oy, ox) if r == rb
                          else jnp.zeros((c_out, c_in), jnp.float32)
                          for (r, oy, ox) in taps]
                rows.append(jnp.concatenate(blocks, axis=1))
            w_dil = jnp.concatenate(rows, axis=0).astype(cdt)             # (3*c_out, T*c_in)
        else:
            w_dil = jnp.concatenate([tap_w(*t) for t in taps], axis=1).astype(cdt)
        pmax = max(max(abs(oy), abs(ox)) for (_, oy, ox) in taps)
        xp = jnp.pad(x.astype(cdt), ((0, 0), (0, 0), (pmax, pmax), (pmax, pmax)))
        x_taps = jnp.stack(
            [xp[:, :, pmax + oy:pmax + oy + height, pmax + ox:pmax + ox + width]
             for (_, oy, ox) in taps], axis=1).reshape(n, t_total * c_in, hw)
    else:
        # Degenerate: every dilated offset falls outside -> branches are center-only.
        w_dil = jnp.zeros((3 * c_out if stacked else c_out, c_in), cdt)
        x_taps = x.reshape(n, c_in, hw).astype(cdt)

    # Fold the five branch GroupNorm affines into conv_out:
    #   out = sum_k (W_k * gamma_k) @ norm_k + sum_k W_k @ beta_k
    w_out = params["w_out"].reshape(c_out, 5, c_out)
    gammas = jnp.stack([params["g1_w"], params["g2_w"], params["g3_w"],
                        params["g4_w"], params["g5_w"]], axis=0)          # (5, c_out)
    betas = jnp.stack([params["g1_b"], params["g2_b"], params["g3_b"],
                       params["g4_b"], params["g5_b"]], axis=0)           # (5, c_out)
    w_out_scaled = (w_out * gammas[None]).reshape(c_out, 5 * c_out).astype(cdt)
    bias = jnp.sum(w_out * betas[None], axis=(1, 2))                      # (c_out,)
    cols = jnp.stack([bias, params["go_w"], params["go_b"]], axis=1).astype(jnp.float32)

    x_flat = x.reshape(n, c_in, hw).astype(cdt)
    t_rows = x_taps.shape[1]

    kernel = partial(_aspp_kernel, tap_counts=tap_counts, c_in=c_in, c_out=c_out,
                     hw=hw, eps=eps, stacked=stacked)

    # VMEM budget from actual block sizes (double-buffered streams + weights +
    # a rough allowance for f32 intermediates), capped below physical limits.
    blk_bytes = (c_in + t_rows) * hw * 2 + c_out * hw * x.dtype.itemsize
    w_bytes = 2 * (w_a.size + w_dil.size + w_out_scaled.size) + 4 * cols.size
    tmp_bytes = 24 * c_out * hw * 4
    vmem_limit = int(min(96 << 20,
                         max(32 << 20, 2 * blk_bytes + 2 * w_bytes + tmp_bytes + (4 << 20))))

    flops_per_sample = (2 * hw * (w_a.shape[0] * c_in
                                  + w_dil.shape[0] * w_dil.shape[1]
                                  + 4 * c_out * c_out)
                        + 2 * c_out * c_out)
    cost = pl.CostEstimate(flops=int(n * flops_per_sample),
                           transcendentals=0,
                           bytes_accessed=int(n * blk_bytes + w_bytes))

    out_flat = pl.pallas_call(
        kernel,
        out_shape=jax.ShapeDtypeStruct((n, c_out, hw), x.dtype),
        grid=(n,),
        in_specs=[
            pl.BlockSpec((1, c_in, hw), lambda i: (i, 0, 0)),      # x (per sample)
            pl.BlockSpec((1, t_rows, hw), lambda i: (i, 0, 0)),    # im2col'd dilated taps
            pl.BlockSpec(w_a.shape, lambda i: (0, 0)),             # conv1|conv5|centers
            pl.BlockSpec(w_dil.shape, lambda i: (0, 0)),           # dilated-tap weights
            pl.BlockSpec(w_out_scaled.shape, lambda i: (0, 0)),    # conv_out (gamma-folded)
            pl.BlockSpec(cols.shape, lambda i: (0, 0)),            # bias | ln_out gamma/beta
        ],
        out_specs=pl.BlockSpec((1, c_out, hw), lambda i: (i, 0, 0)),
        compiler_params=pltpu.CompilerParams(
            # Megacore: batch samples shard across TensorCores.
            # TODO(synk): add a second parallel (hw-tile) axis for v7x when n is small.
            dimension_semantics=("parallel",),
            vmem_limit_bytes=vmem_limit),
        cost_estimate=cost,
    )(x_flat, x_taps, w_a, w_dil, w_out_scaled, cols)

    return out_flat.reshape(n, c_out, height, width)


# ----------------------------- pure-JAX reference -----------------------------
def aspp_reference(x, params, *, eps=1e-5):
    def conv(v, w, dil):
        pad = dil * (w.shape[-1] // 2)
        return lax.conv_general_dilated(
            v, w, window_strides=(1, 1),
            padding=((pad, pad), (pad, pad)),
            rhs_dilation=(dil, dil),
            dimension_numbers=("NCHW", "OIHW", "NCHW"),
            precision=lax.Precision.HIGHEST)

    def gn(v, gamma, beta, groups):
        nb, c = v.shape[:2]
        vg = v.reshape(nb, groups, -1)
        m = vg.mean(axis=2, keepdims=True)
        var = jnp.square(vg - m).mean(axis=2, keepdims=True)
        vn = ((vg - m) / jnp.sqrt(var + eps)).reshape(v.shape)
        return vn * gamma[None, :, None, None] + beta[None, :, None, None]

    nb, _, h, w = x.shape
    x1 = gn(conv(x, params["w1"], 1), params["g1_w"], params["g1_b"], 2)
    x2 = gn(conv(x, params["w2"], 6), params["g2_w"], params["g2_b"], 2)
    x3 = gn(conv(x, params["w3"], 12), params["g3_w"], params["g3_b"], 2)
    x4 = gn(conv(x, params["w4"], 18), params["g4_w"], params["g4_b"], 2)
    pooled = x.mean(axis=(2, 3), keepdims=True)
    x5 = gn(conv(pooled, params["w5"], 1), params["g5_w"], params["g5_b"], 2)
    x5 = jnp.broadcast_to(x5, x5.shape[:2] + (h, w))   # bilinear from 1x1, align_corners=True
    cat = jnp.concatenate([x1, x2, x3, x4, x5], axis=1)
    out = conv(cat, params["w_out"], 1)
    return gn(out, params["go_w"], params["go_b"], 1)


if __name__ == "__main__":
    N, C_IN, C_OUT, H, W = 2, 4, 8, 16, 16
    key = jax.random.PRNGKey(0)
    keys = jax.random.split(key, 8)

    x = jax.random.normal(keys[0], (N, C_IN, H, W), dtype=jnp.float32)

    def _w(k, shape, fan_in):
        return jax.random.normal(k, shape, dtype=jnp.float32) / np.sqrt(float(fan_in))

    params = {
        "w1": _w(keys[1], (C_OUT, C_IN, 1, 1), C_IN),
        "w2": _w(keys[2], (C_OUT, C_IN, 3, 3), 9 * C_IN),
        "w3": _w(keys[3], (C_OUT, C_IN, 3, 3), 9 * C_IN),
        "w4": _w(keys[4], (C_OUT, C_IN, 3, 3), 9 * C_IN),
        "w5": _w(keys[5], (C_OUT, C_IN, 1, 1), C_IN),
        "w_out": _w(keys[6], (C_OUT, 5 * C_OUT, 1, 1), 5 * C_OUT),
    }
    gk = jax.random.split(keys[7], 12)
    for i, nm in enumerate(["g1", "g2", "g3", "g4", "g5", "go"]):
        params[f"{nm}_w"] = 1.0 + 0.1 * jax.random.normal(gk[2 * i], (C_OUT,), dtype=jnp.float32)
        params[f"{nm}_b"] = 0.1 * jax.random.normal(gk[2 * i + 1], (C_OUT,), dtype=jnp.float32)

    out = jax.jit(aspp_forward)(x, params)
    out = jax.block_until_ready(out)
    assert out.shape == (N, C_OUT, H, W) and out.dtype == x.dtype
    assert bool(jnp.all(jnp.isfinite(out)))

    ref = jax.block_until_ready(aspp_reference(x, params))
    # Tolerance accounts for single-pass bf16 MXU operands (f32 accumulation).
    if not bool(jnp.allclose(out, ref, atol=3e-2, rtol=3e-2)):
        raise AssertionError(
            f"Pallas ASPP mismatch vs JAX reference (max abs err "
            f"{float(jnp.max(jnp.abs(out - ref)))})")

    print("KERNEL_OK")
</pallas_src>

<mosaic_0001>
module attributes {stable_mosaic.version = 11 : i64} {
  func.func @_aspp_kernel(%arg0: i32, %arg1: memref<1x4x256xbf16, #tpu.memory_space<vmem>>, %arg2: memref<1x64x256xbf16, #tpu.memory_space<vmem>>, %arg3: memref<40x4xbf16, #tpu.memory_space<vmem>>, %arg4: memref<24x64xbf16, #tpu.memory_space<vmem>>, %arg5: memref<8x40xbf16, #tpu.memory_space<vmem>>, %arg6: memref<8x3xf32, #tpu.memory_space<vmem>>, %arg7: memref<1x8x256xf32, #tpu.memory_space<vmem>>) attributes {dimension_semantics = [#tpu.dimension_semantics<parallel>], iteration_bounds = array<i64: 2>, scalar_prefetch = 0 : i64, scratch_operands = 0 : i64, tpu.core_type = #tpu.core_type<tc>, window_params = [{transform_indices = @transform_0, window_bounds = array<i64: 1, 4, 256>}, {transform_indices = @transform_1, window_bounds = array<i64: 1, 64, 256>}, {pipeline_mode = #tpu.pipeline_mode<synchronous>, transform_indices = @transform_2, window_bounds = array<i64: 40, 4>}, {pipeline_mode = #tpu.pipeline_mode<synchronous>, transform_indices = @transform_3, window_bounds = array<i64: 24, 64>}, {pipeline_mode = #tpu.pipeline_mode<synchronous>, transform_indices = @transform_4, window_bounds = array<i64: 8, 40>}, {pipeline_mode = #tpu.pipeline_mode<synchronous>, transform_indices = @transform_5, window_bounds = array<i64: 8, 3>}, {transform_indices = @transform_6, window_bounds = array<i64: 1, 8, 256>}]} {
    %c0 = arith.constant 0 : index
    %c0_0 = arith.constant 0 : index
    %c0_1 = arith.constant 0 : index
    %0 = vector.load %arg1[%c0, %c0_0, %c0_1] : memref<1x4x256xbf16, #tpu.memory_space<vmem>>, vector<1x4x256xbf16>
    %1 = vector.shape_cast %0 : vector<1x4x256xbf16> to vector<4x256xbf16>
    %c0_2 = arith.constant 0 : index
    %c0_3 = arith.constant 0 : index
    %c0_4 = arith.constant 0 : index
    %2 = vector.load %arg2[%c0_2, %c0_3, %c0_4] : memref<1x64x256xbf16, #tpu.memory_space<vmem>>, vector<1x64x256xbf16>
    %3 = vector.shape_cast %2 : vector<1x64x256xbf16> to vector<64x256xbf16>
    %c0_5 = arith.constant 0 : index
    %c0_6 = arith.constant 0 : index
    %4 = vector.load %arg3[%c0_5, %c0_6] : memref<40x4xbf16, #tpu.memory_space<vmem>>, vector<40x4xbf16>
    %c0_7 = arith.constant 0 : index
    %c0_8 = arith.constant 0 : index
    %5 = vector.load %arg4[%c0_7, %c0_8] : memref<24x64xbf16, #tpu.memory_space<vmem>>, vector<24x64xbf16>
    %c0_9 = arith.constant 0 : index
    %c0_10 = arith.constant 0 : index
    %6 = vector.load %arg5[%c0_9, %c0_10] : memref<8x40xbf16, #tpu.memory_space<vmem>>, vector<8x40xbf16>
    %c0_11 = arith.constant 0 : index
    %c0_12 = arith.constant 0 : index
    %7 = vector.load %arg6[%c0_11, %c0_12] : memref<8x3xf32, #tpu.memory_space<vmem>>, vector<8x3xf32>
    %cst = arith.constant dense<0.000000e+00> : vector<40x256xf32>
    %8 = tpu.matmul %4, %1, %cst {dimension_numbers = #tpu.dot_dimension_numbers<[1], [0], [0], [1], [0, 0, 1, 1], [], []>} : vector<40x4xbf16>, vector<4x256xbf16>, vector<40x256xf32> -> vector<40x256xf32>
    %9 = vector.extract_strided_slice %8 {offsets = [0, 0], sizes = [8, 256], strides = [1, 1]} : vector<40x256xf32> to vector<8x256xf32>
    %10 = vector.extract_strided_slice %8 {offsets = [8, 0], sizes = [8, 256], strides = [1, 1]} : vector<40x256xf32> to vector<8x256xf32>
    %cst_13 = arith.constant dense<0.000000e+00> : vector<8xf32>
    %11 = vector.multi_reduction <add>, %10, %cst_13 [1] : vector<8x256xf32> to vector<8xf32>
    %12 = vector.shape_cast %11 : vector<8xf32> to vector<8x1xf32>
    %cst_14 = arith.constant 3.906250e-03 : f32
    %13 = vector.broadcast %cst_14 : f32 to vector<8x1xf32>
    %14 = arith.mulf %12, %13 : vector<8x1xf32>
    %15 = vector.extract_strided_slice %8 {offsets = [16, 0], sizes = [8, 256], strides = [1, 1]} : vector<40x256xf32> to vector<8x256xf32>
    %16 = vector.extract_strided_slice %8 {offsets = [24, 0], sizes = [8, 256], strides = [1, 1]} : vector<40x256xf32> to vector<8x256xf32>
    %17 = vector.extract_strided_slice %8 {offsets = [32, 0], sizes = [8, 256], strides = [1, 1]} : vector<40x256xf32> to vector<8x256xf32>
    %cst_15 = arith.constant dense<0.000000e+00> : vector<24x256xf32>
    %18 = tpu.matmul %5, %3, %cst_15 {dimension_numbers = #tpu.dot_dimension_numbers<[1], [0], [0], [1], [0, 0, 1, 1], [], []>} : vector<24x64xbf16>, vector<64x256xbf16>, vector<24x256xf32> -> vector<24x256xf32>
    %19 = vector.extract_strided_slice %18 {offsets = [0, 0], sizes = [8, 256], strides = [1, 1]} : vector<24x256xf32> to vector<8x256xf32>
    %20 = arith.addf %15, %19 : vector<8x256xf32>
    %21 = vector.extract_strided_slice %18 {offsets = [8, 0], sizes = [8, 256], strides = [1, 1]} : vector<24x256xf32> to vector<8x256xf32>
    %22 = arith.addf %16, %21 : vector<8x256xf32>
    %23 = vector.extract_strided_slice %18 {offsets = [16, 0], sizes = [8, 256], strides = [1, 1]} : vector<24x256xf32> to vector<8x256xf32>
    %24 = arith.addf %17, %23 : vector<8x256xf32>
    %25 = vector.extract_strided_slice %9 {offsets = [0, 0], sizes = [4, 256], strides = [1, 1]} : vector<8x256xf32> to vector<4x256xf32>
    %cst_16 = arith.constant dense<0.000000e+00> : vector<4xf32>
    %26 = vector.multi_reduction <add>, %25, %cst_16 [1] : vector<4x256xf32> to vector<4xf32>
    %27 = vector.shape_cast %26 : vector<4xf32> to vector<4x1xf32>
    %cst_17 = arith.constant dense<0.000000e+00> : vector<1xf32>
    %28 = vector.multi_reduction <add>, %27, %cst_17 [0] : vector<4x1xf32> to vector<1xf32>
    %29 = vector.shape_cast %28 : vector<1xf32> to vector<1x1xf32>
    %cst_18 = arith.constant 9.765625E-4 : f32
    %30 = vector.broadcast %cst_18 : f32 to vector<1x1xf32>
    %31 = arith.mulf %29, %30 : vector<1x1xf32>
    %32 = vector.broadcast %31 : vector<1x1xf32> to vector<4x256xf32>
    %33 = arith.subf %25, %32 : vector<4x256xf32>
    %34 = arith.mulf %33, %33 : vector<4x256xf32>
    %cst_19 = arith.constant dense<0.000000e+00> : vector<4xf32>
    %35 = vector.multi_reduction <add>, %34, %cst_19 [1] : vector<4x256xf32> to vector<4xf32>
    %36 = vector.shape_cast %35 : vector<4xf32> to vector<4x1xf32>
    %cst_20 = arith.constant dense<0.000000e+00> : vector<1xf32>
    %37 = vector.multi_reduction <add>, %36, %cst_20 [0] : vector<4x1xf32> to vector<1xf32>
    %38 = vector.shape_cast %37 : vector<1xf32> to vector<1x1xf32>
    %cst_21 = arith.constant 9.765625E-4 : f32
    %39 = vector.broadcast %cst_21 : f32 to vector<1x1xf32>
    %40 = arith.mulf %38, %39 : vector<1x1xf32>
    %cst_22 = arith.constant 9.99999974E-6 : f32
    %41 = vector.broadcast %cst_22 : f32 to vector<1x1xf32>
    %42 = arith.addf %40, %41 : vector<1x1xf32>
    %43 = math.rsqrt %42 : vector<1x1xf32>
    %44 = vector.broadcast %43 : vector<1x1xf32> to vector<4x256xf32>
    %45 = arith.mulf %33, %44 : vector<4x256xf32>
    %46 = vector.extract_strided_slice %9 {offsets = [4, 0], sizes = [4, 256], strides = [1, 1]} : vector<8x256xf32> to vector<4x256xf32>
    %cst_23 = arith.constant dense<0.000000e+00> : vector<4xf32>
    %47 = vector.multi_reduction <add>, %46, %cst_23 [1] : vector<4x256xf32> to vector<4xf32>
    %48 = vector.shape_cast %47 : vector<4xf32> to vector<4x1xf32>
    %cst_24 = arith.constant dense<0.000000e+00> : vector<1xf32>
    %49 = vector.multi_reduction <add>, %48, %cst_24 [0] : vector<4x1xf32> to vector<1xf32>
    %50 = vector.shape_cast %49 : vector<1xf32> to vector<1x1xf32>
    %cst_25 = arith.constant 9.765625E-4 : f32
    %51 = vector.broadcast %cst_25 : f32 to vector<1x1xf32>
    %52 = arith.mulf %50, %51 : vector<1x1xf32>
    %53 = vector.broadcast %52 : vector<1x1xf32> to vector<4x256xf32>
    %54 = arith.subf %46, %53 : vector<4x256xf32>
    %55 = arith.mulf %54, %54 : vector<4x256xf32>
    %cst_26 = arith.constant dense<0.000000e+00> : vector<4xf32>
    %56 = vector.multi_reduction <add>, %55, %cst_26 [1] : vector<4x256xf32> to vector<4xf32>
    %57 = vector.shape_cast %56 : vector<4xf32> to vector<4x1xf32>
    %cst_27 = arith.constant dense<0.000000e+00> : vector<1xf32>
    %58 = vector.multi_reduction <add>, %57, %cst_27 [0] : vector<4x1xf32> to vector<1xf32>
    %59 = vector.shape_cast %58 : vector<1xf32> to vector<1x1xf32>
    %cst_28 = arith.constant 9.765625E-4 : f32
    %60 = vector.broadcast %cst_28 : f32 to vector<1x1xf32>
    %61 = arith.mulf %59, %60 : vector<1x1xf32>
    %cst_29 = arith.constant 9.99999974E-6 : f32
    %62 = vector.broadcast %cst_29 : f32 to vector<1x1xf32>
    %63 = arith.addf %61, %62 : vector<1x1xf32>
    %64 = math.rsqrt %63 : vector<1x1xf32>
    %65 = vector.broadcast %64 : vector<1x1xf32> to vector<4x256xf32>
    %66 = arith.mulf %54, %65 : vector<4x256xf32>
    %67 = tpu.concatenate %45, %66 in 0 : vector<4x256xf32>, vector<4x256xf32> -> vector<8x256xf32>
    %68 = vector.extract_strided_slice %20 {offsets = [0, 0], sizes = [4, 256], strides = [1, 1]} : vector<8x256xf32> to vector<4x256xf32>
    %cst_30 = arith.constant dense<0.000000e+00> : vector<4xf32>
    %69 = vector.multi_reduction <add>, %68, %cst_30 [1] : vector<4x256xf32> to vector<4xf32>
    %70 = vector.shape_cast %69 : vector<4xf32> to vector<4x1xf32>
    %cst_31 = arith.constant dense<0.000000e+00> : vector<1xf32>
    %71 = vector.multi_reduction <add>, %70, %cst_31 [0] : vector<4x1xf32> to vector<1xf32>
    %72 = vector.shape_cast %71 : vector<1xf32> to vector<1x1xf32>
    %cst_32 = arith.constant 9.765625E-4 : f32
    %73 = vector.broadcast %cst_32 : f32 to vector<1x1xf32>
    %74 = arith.mulf %72, %73 : vector<1x1xf32>
    %75 = vector.broadcast %74 : vector<1x1xf32> to vector<4x256xf32>
    %76 = arith.subf %68, %75 : vector<4x256xf32>
    %77 = arith.mulf %76, %76 : vector<4x256xf32>
    %cst_33 = arith.constant dense<0.000000e+00> : vector<4xf32>
    %78 = vector.multi_reduction <add>, %77, %cst_33 [1] : vector<4x256xf32> to vector<4xf32>
    %79 = vector.shape_cast %78 : vector<4xf32> to vector<4x1xf32>
    %cst_34 = arith.constant dense<0.000000e+00> : vector<1xf32>
    %80 = vector.multi_reduction <add>, %79, %cst_34 [0] : vector<4x1xf32> to vector<1xf32>
    %81 = vector.shape_cast %80 : vector<1xf32> to vector<1x1xf32>
    %cst_35 = arith.constant 9.765625E-4 : f32
    %82 = vector.broadcast %cst_35 : f32 to vector<1x1xf32>
    %83 = arith.mulf %81, %82 : vector<1x1xf32>
    %cst_36 = arith.constant 9.99999974E-6 : f32
    %84 = vector.broadcast %cst_36 : f32 to vector<1x1xf32>
    %85 = arith.addf %83, %84 : vector<1x1xf32>
    %86 = math.rsqrt %85 : vector<1x1xf32>
    %87 = vector.broadcast %86 : vector<1x1xf32> to vector<4x256xf32>
    %88 = arith.mulf %76, %87 : vector<4x256xf32>
    %89 = vector.extract_strided_slice %20 {offsets = [4, 0], sizes = [4, 256], strides = [1, 1]} : vector<8x256xf32> to vector<4x256xf32>
    %cst_37 = arith.constant dense<0.000000e+00> : vector<4xf32>
    %90 = vector.multi_reduction <add>, %89, %cst_37 [1] : vector<4x256xf32> to vector<4xf32>
    %91 = vector.shape_cast %90 : vector<4xf32> to vector<4x1xf32>
    %cst_38 = arith.constant dense<0.000000e+00> : vector<1xf32>
    %92 = vector.multi_reduction <add>, %91, %cst_38 [0] : vector<4x1xf32> to vector<1xf32>
    %93 = vector.shape_cast %92 : vector<1xf32> to vector<1x1xf32>
    %cst_39 = arith.constant 9.765625E-4 : f32
    %94 = vector.broadcast %cst_39 : f32 to vector<1x1xf32>
    %95 = arith.mulf %93, %94 : vector<1x1xf32>
    %96 = vector.broadcast %95 : vector<1x1xf32> to vector<4x256xf32>
    %97 = arith.subf %89, %96 : vector<4x256xf32>
    %98 = arith.mulf %97, %97 : vector<4x256xf32>
    %cst_40 = arith.constant dense<0.000000e+00> : vector<4xf32>
    %99 = vector.multi_reduction <add>, %98, %cst_40 [1] : vector<4x256xf32> to vector<4xf32>
    %100 = vector.shape_cast %99 : vector<4xf32> to vector<4x1xf32>
    %cst_41 = arith.constant dense<0.000000e+00> : vector<1xf32>
    %101 = vector.multi_reduction <add>, %100, %cst_41 [0] : vector<4x1xf32> to vector<1xf32>
    %102 = vector.shape_cast %101 : vector<1xf32> to vector<1x1xf32>
    %cst_42 = arith.constant 9.765625E-4 : f32
    %103 = vector.broadcast %cst_42 : f32 to vector<1x1xf32>
    %104 = arith.mulf %102, %103 : vector<1x1xf32>
    %cst_43 = arith.constant 9.99999974E-6 : f32
    %105 = vector.broadcast %cst_43 : f32 to vector<1x1xf32>
    %106 = arith.addf %104, %105 : vector<1x1xf32>
    %107 = math.rsqrt %106 : vector<1x1xf32>
    %108 = vector.broadcast %107 : vector<1x1xf32> to vector<4x256xf32>
    %109 = arith.mulf %97, %108 : vector<4x256xf32>
    %110 = tpu.concatenate %88, %109 in 0 : vector<4x256xf32>, vector<4x256xf32> -> vector<8x256xf32>
    %111 = vector.extract_strided_slice %22 {offsets = [0, 0], sizes = [4, 256], strides = [1, 1]} : vector<8x256xf32> to vector<4x256xf32>
    %cst_44 = arith.constant dense<0.000000e+00> : vector<4xf32>
    %112 = vector.multi_reduction <add>, %111, %cst_44 [1] : vector<4x256xf32> to vector<4xf32>
    %113 = vector.shape_cast %112 : vector<4xf32> to vector<4x1xf32>
    %cst_45 = arith.constant dense<0.000000e+00> : vector<1xf32>
    %114 = vector.multi_reduction <add>, %113, %cst_45 [0] : vector<4x1xf32> to vector<1xf32>
    %115 = vector.shape_cast %114 : vector<1xf32> to vector<1x1xf32>
    %cst_46 = arith.constant 9.765625E-4 : f32
    %116 = vector.broadcast %cst_46 : f32 to vector<1x1xf32>
    %117 = arith.mulf %115, %116 : vector<1x1xf32>
    %118 = vector.broadcast %117 : vector<1x1xf32> to vector<4x256xf32>
    %119 = arith.subf %111, %118 : vector<4x256xf32>
    %120 = arith.mulf %119, %119 : vector<4x256xf32>
    %cst_47 = arith.constant dense<0.000000e+00> : vector<4xf32>
    %121 = vector.multi_reduction <add>, %120, %cst_47 [1] : vector<4x256xf32> to vector<4xf32>
    %122 = vector.shape_cast %121 : vector<4xf32> to vector<4x1xf32>
    %cst_48 = arith.constant dense<0.000000e+00> : vector<1xf32>
    %123 = vector.multi_reduction <add>, %122, %cst_48 [0] : vector<4x1xf32> to vector<1xf32>
    %124 = vector.shape_cast %123 : vector<1xf32> to vector<1x1xf32>
    %cst_49 = arith.constant 9.765625E-4 : f32
    %125 = vector.broadcast %cst_49 : f32 to vector<1x1xf32>
    %126 = arith.mulf %124, %125 : vector<1x1xf32>
    %cst_50 = arith.constant 9.99999974E-6 : f32
    %127 = vector.broadcast %cst_50 : f32 to vector<1x1xf32>
    %128 = arith.addf %126, %127 : vector<1x1xf32>
    %129 = math.rsqrt %128 : vector<1x1xf32>
    %130 = vector.broadcast %129 : vector<1x1xf32> to vector<4x256xf32>
    %131 = arith.mulf %119, %130 : vector<4x256xf32>
    %132 = vector.extract_strided_slice %22 {offsets = [4, 0], sizes = [4, 256], strides = [1, 1]} : vector<8x256xf32> to vector<4x256xf32>
    %cst_51 = arith.constant dense<0.000000e+00> : vector<4xf32>
    %133 = vector.multi_reduction <add>, %132, %cst_51 [1] : vector<4x256xf32> to vector<4xf32>
    %134 = vector.shape_cast %133 : vector<4xf32> to vector<4x1xf32>
    %cst_52 = arith.constant dense<0.000000e+00> : vector<1xf32>
    %135 = vector.multi_reduction <add>, %134, %cst_52 [0] : vector<4x1xf32> to vector<1xf32>
    %136 = vector.shape_cast %135 : vector<1xf32> to vector<1x1xf32>
    %cst_53 = arith.constant 9.765625E-4 : f32
    %137 = vector.broadcast %cst_53 : f32 to vector<1x1xf32>
    %138 = arith.mulf %136, %137 : vector<1x1xf32>
    %139 = vector.broadcast %138 : vector<1x1xf32> to vector<4x256xf32>
    %140 = arith.subf %132, %139 : vector<4x256xf32>
    %141 = arith.mulf %140, %140 : vector<4x256xf32>
    %cst_54 = arith.constant dense<0.000000e+00> : vector<4xf32>
    %142 = vector.multi_reduction <add>, %141, %cst_54 [1] : vector<4x256xf32> to vector<4xf32>
    %143 = vector.shape_cast %142 : vector<4xf32> to vector<4x1xf32>
    %cst_55 = arith.constant dense<0.000000e+00> : vector<1xf32>
    %144 = vector.multi_reduction <add>, %143, %cst_55 [0] : vector<4x1xf32> to vector<1xf32>
    %145 = vector.shape_cast %144 : vector<1xf32> to vector<1x1xf32>
    %cst_56 = arith.constant 9.765625E-4 : f32
    %146 = vector.broadcast %cst_56 : f32 to vector<1x1xf32>
    %147 = arith.mulf %145, %146 : vector<1x1xf32>
    %cst_57 = arith.constant 9.99999974E-6 : f32
    %148 = vector.broadcast %cst_57 : f32 to vector<1x1xf32>
    %149 = arith.addf %147, %148 : vector<1x1xf32>
    %150 = math.rsqrt %149 : vector<1x1xf32>
    %151 = vector.broadcast %150 : vector<1x1xf32> to vector<4x256xf32>
    %152 = arith.mulf %140, %151 : vector<4x256xf32>
    %153 = tpu.concatenate %131, %152 in 0 : vector<4x256xf32>, vector<4x256xf32> -> vector<8x256xf32>
    %154 = vector.extract_strided_slice %24 {offsets = [0, 0], sizes = [4, 256], strides = [1, 1]} : vector<8x256xf32> to vector<4x256xf32>
    %cst_58 = arith.constant dense<0.000000e+00> : vector<4xf32>
    %155 = vector.multi_reduction <add>, %154, %cst_58 [1] : vector<4x256xf32> to vector<4xf32>
    %156 = vector.shape_cast %155 : vector<4xf32> to vector<4x1xf32>
    %cst_59 = arith.constant dense<0.000000e+00> : vector<1xf32>
    %157 = vector.multi_reduction <add>, %156, %cst_59 [0] : vector<4x1xf32> to vector<1xf32>
    %158 = vector.shape_cast %157 : vector<1xf32> to vector<1x1xf32>
    %cst_60 = arith.constant 9.765625E-4 : f32
    %159 = vector.broadcast %cst_60 : f32 to vector<1x1xf32>
    %160 = arith.mulf %158, %159 : vector<1x1xf32>
    %161 = vector.broadcast %160 : vector<1x1xf32> to vector<4x256xf32>
    %162 = arith.subf %154, %161 : vector<4x256xf32>
    %163 = arith.mulf %162, %162 : vector<4x256xf32>
    %cst_61 = arith.constant dense<0.000000e+00> : vector<4xf32>
    %164 = vector.multi_reduction <add>, %163, %cst_61 [1] : vector<4x256xf32> to vector<4xf32>
    %165 = vector.shape_cast %164 : vector<4xf32> to vector<4x1xf32>
    %cst_62 = arith.constant dense<0.000000e+00> : vector<1xf32>
    %166 = vector.multi_reduction <add>, %165, %cst_62 [0] : vector<4x1xf32> to vector<1xf32>
    %167 = vector.shape_cast %166 : vector<1xf32> to vector<1x1xf32>
    %cst_63 = arith.constant 9.765625E-4 : f32
    %168 = vector.broadcast %cst_63 : f32 to vector<1x1xf32>
    %169 = arith.mulf %167, %168 : vector<1x1xf32>
    %cst_64 = arith.constant 9.99999974E-6 : f32
    %170 = vector.broadcast %cst_64 : f32 to vector<1x1xf32>
    %171 = arith.addf %169, %170 : vector<1x1xf32>
    %172 = math.rsqrt %171 : vector<1x1xf32>
    %173 = vector.broadcast %172 : vector<1x1xf32> to vector<4x256xf32>
    %174 = arith.mulf %162, %173 : vector<4x256xf32>
    %175 = vector.extract_strided_slice %24 {offsets = [4, 0], sizes = [4, 256], strides = [1, 1]} : vector<8x256xf32> to vector<4x256xf32>
    %cst_65 = arith.constant dense<0.000000e+00> : vector<4xf32>
    %176 = vector.multi_reduction <add>, %175, %cst_65 [1] : vector<4x256xf32> to vector<4xf32>
    %177 = vector.shape_cast %176 : vector<4xf32> to vector<4x1xf32>
    %cst_66 = arith.constant dense<0.000000e+00> : vector<1xf32>
    %178 = vector.multi_reduction <add>, %177, %cst_66 [0] : vector<4x1xf32> to vector<1xf32>
    %179 = vector.shape_cast %178 : vector<1xf32> to vector<1x1xf32>
    %cst_67 = arith.constant 9.765625E-4 : f32
    %180 = vector.broadcast %cst_67 : f32 to vector<1x1xf32>
    %181 = arith.mulf %179, %180 : vector<1x1xf32>
    %182 = vector.broadcast %181 : vector<1x1xf32> to vector<4x256xf32>
    %183 = arith.subf %175, %182 : vector<4x256xf32>
    %184 = arith.mulf %183, %183 : vector<4x256xf32>
    %cst_68 = arith.constant dense<0.000000e+00> : vector<4xf32>
    %185 = vector.multi_reduction <add>, %184, %cst_68 [1] : vector<4x256xf32> to vector<4xf32>
    %186 = vector.shape_cast %185 : vector<4xf32> to vector<4x1xf32>
    %cst_69 = arith.constant dense<0.000000e+00> : vector<1xf32>
    %187 = vector.multi_reduction <add>, %186, %cst_69 [0] : vector<4x1xf32> to vector<1xf32>
    %188 = vector.shape_cast %187 : vector<1xf32> to vector<1x1xf32>
    %cst_70 = arith.constant 9.765625E-4 : f32
    %189 = vector.broadcast %cst_70 : f32 to vector<1x1xf32>
    %190 = arith.mulf %188, %189 : vector<1x1xf32>
    %cst_71 = arith.constant 9.99999974E-6 : f32
    %191 = vector.broadcast %cst_71 : f32 to vector<1x1xf32>
    %192 = arith.addf %190, %191 : vector<1x1xf32>
    %193 = math.rsqrt %192 : vector<1x1xf32>
    %194 = vector.broadcast %193 : vector<1x1xf32> to vector<4x256xf32>
    %195 = arith.mulf %183, %194 : vector<4x256xf32>
    %196 = tpu.concatenate %174, %195 in 0 : vector<4x256xf32>, vector<4x256xf32> -> vector<8x256xf32>
    %197 = vector.extract_strided_slice %14 {offsets = [0, 0], sizes = [4, 1], strides = [1, 1]} : vector<8x1xf32> to vector<4x1xf32>
    %cst_72 = arith.constant dense<0.000000e+00> : vector<4xf32>
    %198 = vector.multi_reduction <add>, %197, %cst_72 [1] : vector<4x1xf32> to vector<4xf32>
    %199 = vector.shape_cast %198 : vector<4xf32> to vector<4x1xf32>
    %cst_73 = arith.constant dense<0.000000e+00> : vector<1xf32>
    %200 = vector.multi_reduction <add>, %199, %cst_73 [0] : vector<4x1xf32> to vector<1xf32>
    %201 = vector.shape_cast %200 : vector<1xf32> to vector<1x1xf32>
    %cst_74 = arith.constant 2.500000e-01 : f32
    %202 = vector.broadcast %cst_74 : f32 to vector<1x1xf32>
    %203 = arith.mulf %201, %202 : vector<1x1xf32>
    %204 = vector.broadcast %203 : vector<1x1xf32> to vector<4x1xf32>
    %205 = arith.subf %197, %204 : vector<4x1xf32>
    %206 = arith.mulf %205, %205 : vector<4x1xf32>
    %cst_75 = arith.constant dense<0.000000e+00> : vector<4xf32>
    %207 = vector.multi_reduction <add>, %206, %cst_75 [1] : vector<4x1xf32> to vector<4xf32>
    %208 = vector.shape_cast %207 : vector<4xf32> to vector<4x1xf32>
    %cst_76 = arith.constant dense<0.000000e+00> : vector<1xf32>
    %209 = vector.multi_reduction <add>, %208, %cst_76 [0] : vector<4x1xf32> to vector<1xf32>
    %210 = vector.shape_cast %209 : vector<1xf32> to vector<1x1xf32>
    %cst_77 = arith.constant 2.500000e-01 : f32
    %211 = vector.broadcast %cst_77 : f32 to vector<1x1xf32>
    %212 = arith.mulf %210, %211 : vector<1x1xf32>
    %cst_78 = arith.constant 9.99999974E-6 : f32
    %213 = vector.broadcast %cst_78 : f32 to vector<1x1xf32>
    %214 = arith.addf %212, %213 : vector<1x1xf32>
    %215 = math.rsqrt %214 : vector<1x1xf32>
    %216 = vector.broadcast %215 : vector<1x1xf32> to vector<4x1xf32>
    %217 = arith.mulf %205, %216 : vector<4x1xf32>
    %218 = vector.extract_strided_slice %14 {offsets = [4, 0], sizes = [4, 1], strides = [1, 1]} : vector<8x1xf32> to vector<4x1xf32>
    %cst_79 = arith.constant dense<0.000000e+00> : vector<4xf32>
    %219 = vector.multi_reduction <add>, %218, %cst_79 [1] : vector<4x1xf32> to vector<4xf32>
    %220 = vector.shape_cast %219 : vector<4xf32> to vector<4x1xf32>
    %cst_80 = arith.constant dense<0.000000e+00> : vector<1xf32>
    %221 = vector.multi_reduction <add>, %220, %cst_80 [0] : vector<4x1xf32> to vector<1xf32>
    %222 = vector.shape_cast %221 : vector<1xf32> to vector<1x1xf32>
    %cst_81 = arith.constant 2.500000e-01 : f32
    %223 = vector.broadcast %cst_81 : f32 to vector<1x1xf32>
    %224 = arith.mulf %222, %223 : vector<1x1xf32>
    %225 = vector.broadcast %224 : vector<1x1xf32> to vector<4x1xf32>
    %226 = arith.subf %218, %225 : vector<4x1xf32>
    %227 = arith.mulf %226, %226 : vector<4x1xf32>
    %cst_82 = arith.constant dense<0.000000e+00> : vector<4xf32>
    %228 = vector.multi_reduction <add>, %227, %cst_82 [1] : vector<4x1xf32> to vector<4xf32>
    %229 = vector.shape_cast %228 : vector<4xf32> to vector<4x1xf32>
    %cst_83 = arith.constant dense<0.000000e+00> : vector<1xf32>
    %230 = vector.multi_reduction <add>, %229, %cst_83 [0] : vector<4x1xf32> to vector<1xf32>
    %231 = vector.shape_cast %230 : vector<1xf32> to vector<1x1xf32>
    %cst_84 = arith.constant 2.500000e-01 : f32
    %232 = vector.broadcast %cst_84 : f32 to vector<1x1xf32>
    %233 = arith.mulf %231, %232 : vector<1x1xf32>
    %cst_85 = arith.constant 9.99999974E-6 : f32
    %234 = vector.broadcast %cst_85 : f32 to vector<1x1xf32>
    %235 = arith.addf %233, %234 : vector<1x1xf32>
    %236 = math.rsqrt %235 : vector<1x1xf32>
    %237 = vector.broadcast %236 : vector<1x1xf32> to vector<4x1xf32>
    %238 = arith.mulf %226, %237 : vector<4x1xf32>
    %239 = tpu.concatenate %217, %238 in 0 : vector<4x1xf32>, vector<4x1xf32> -> vector<8x1xf32>
    %240 = tpu.concatenate %67, %110, %153, %196 in 0 : vector<8x256xf32>, vector<8x256xf32>, vector<8x256xf32>, vector<8x256xf32> -> vector<32x256xf32>
    %241 = arith.truncf %240 : vector<32x256xf32> to vector<32x256xbf16>
    %242 = vector.extract_strided_slice %6 {offsets = [0, 0], sizes = [8, 32], strides = [1, 1]} : vector<8x40xbf16> to vector<8x32xbf16>
    %cst_86 = arith.constant dense<0.000000e+00> : vector<8x256xf32>
    %243 = tpu.matmul %242, %241, %cst_86 {dimension_numbers = #tpu.dot_dimension_numbers<[1], [0], [0], [1], [0, 0, 1, 1], [], []>} : vector<8x32xbf16>, vector<32x256xbf16>, vector<8x256xf32> -> vector<8x256xf32>
    %244 = vector.extract_strided_slice %6 {offsets = [0, 32], sizes = [8, 8], strides = [1, 1]} : vector<8x40xbf16> to vector<8x8xbf16>
    %245 = arith.extf %244 : vector<8x8xbf16> to vector<8x8xf32>
    %cst_87 = arith.constant dense<0.000000e+00> : vector<8x1xf32>
    %246 = tpu.matmul %245, %239, %cst_87 {dimension_numbers = #tpu.dot_dimension_numbers<[1], [0], [0], [1], [0, 0, 1, 1], [], []>} : vector<8x8xf32>, vector<8x1xf32>, vector<8x1xf32> -> vector<8x1xf32>
    %247 = vector.extract_strided_slice %7 {offsets = [0, 0], sizes = [8, 1], strides = [1, 1]} : vector<8x3xf32> to vector<8x1xf32>
    %248 = arith.addf %246, %247 : vector<8x1xf32>
    %249 = vector.broadcast %248 : vector<8x1xf32> to vector<8x256xf32>
    %250 = arith.addf %243, %249 : vector<8x256xf32>
    %cst_88 = arith.constant dense<0.000000e+00> : vector<8xf32>
    %251 = vector.multi_reduction <add>, %250, %cst_88 [1] : vector<8x256xf32> to vector<8xf32>
    %252 = vector.shape_cast %251 : vector<8xf32> to vector<8x1xf32>
    %cst_89 = arith.constant dense<0.000000e+00> : vector<1xf32>
    %253 = vector.multi_reduction <add>, %252, %cst_89 [0] : vector<8x1xf32> to vector<1xf32>
    %254 = vector.shape_cast %253 : vector<1xf32> to vector<1x1xf32>
    %cst_90 = arith.constant 4.8828125E-4 : f32
    %255 = vector.broadcast %cst_90 : f32 to vector<1x1xf32>
    %256 = arith.mulf %254, %255 : vector<1x1xf32>
    %257 = vector.broadcast %256 : vector<1x1xf32> to vector<8x256xf32>
    %258 = arith.subf %250, %257 : vector<8x256xf32>
    %259 = arith.mulf %258, %258 : vector<8x256xf32>
    %cst_91 = arith.constant dense<0.000000e+00> : vector<8xf32>
    %260 = vector.multi_reduction <add>, %259, %cst_91 [1] : vector<8x256xf32> to vector<8xf32>
    %261 = vector.shape_cast %260 : vector<8xf32> to vector<8x1xf32>
    %cst_92 = arith.constant dense<0.000000e+00> : vector<1xf32>
    %262 = vector.multi_reduction <add>, %261, %cst_92 [0] : vector<8x1xf32> to vector<1xf32>
    %263 = vector.shape_cast %262 : vector<1xf32> to vector<1x1xf32>
    %cst_93 = arith.constant 4.8828125E-4 : f32
    %264 = vector.broadcast %cst_93 : f32 to vector<1x1xf32>
    %265 = arith.mulf %263, %264 : vector<1x1xf32>
    %cst_94 = arith.constant 9.99999974E-6 : f32
    %266 = vector.broadcast %cst_94 : f32 to vector<1x1xf32>
    %267 = arith.addf %265, %266 : vector<1x1xf32>
    %268 = math.rsqrt %267 : vector<1x1xf32>
    %269 = vector.broadcast %268 : vector<1x1xf32> to vector<8x256xf32>
    %270 = arith.mulf %258, %269 : vector<8x256xf32>
    %271 = vector.extract_strided_slice %7 {offsets = [0, 1], sizes = [8, 1], strides = [1, 1]} : vector<8x3xf32> to vector<8x1xf32>
    %272 = vector.broadcast %271 : vector<8x1xf32> to vector<8x256xf32>
    %273 = arith.mulf %270, %272 : vector<8x256xf32>
    %274 = vector.extract_strided_slice %7 {offsets = [0, 2], sizes = [8, 1], strides = [1, 1]} : vector<8x3xf32> to vector<8x1xf32>
    %275 = vector.broadcast %274 : vector<8x1xf32> to vector<8x256xf32>
    %276 = arith.addf %273, %275 : vector<8x256xf32>
    %c0_95 = arith.constant 0 : index
    %c0_96 = arith.constant 0 : index
    %c0_97 = arith.constant 0 : index
    %277 = vector.load %arg7[%c0_95, %c0_96, %c0_97] : memref<1x8x256xf32, #tpu.memory_space<vmem>>, vector<1x8x256xf32>
    %278 = vector.shape_cast %277 : vector<1x8x256xf32> to vector<8x256xf32>
    %279 = vector.shape_cast %276 : vector<8x256xf32> to vector<1x8x256xf32>
    tpu.vector_store %arg7[%c0_95, %c0_96, %c0_97], %279 {strides = array<i32>} : memref<1x8x256xf32, #tpu.memory_space<vmem>>, vector<1x8x256xf32>,
    return
  }
  func.func @transform_0(%arg0: i32) -> (i32, i32, i32) {
    %c0_i32 = arith.constant 0 : i32
    %c0_i32_0 = arith.constant 0 : i32
    %c0_i32_1 = arith.constant 0 : i32
    return %arg0, %c0_i32, %c0_i32_0 : i32, i32, i32
  }
  func.func @transform_1(%arg0: i32) -> (i32, i32, i32) {
    %c0_i32 = arith.constant 0 : i32
    %c0_i32_0 = arith.constant 0 : i32
    %c0_i32_1 = arith.constant 0 : i32
    return %arg0, %c0_i32, %c0_i32_0 : i32, i32, i32
  }
  func.func @transform_2(%arg0: i32) -> (i32, i32) {
    %c0_i32 = arith.constant 0 : i32
    %c0_i32_0 = arith.constant 0 : i32
    %c0_i32_1 = arith.constant 0 : i32
    return %c0_i32, %c0_i32_0 : i32, i32
  }
  func.func @transform_3(%arg0: i32) -> (i32, i32) {
    %c0_i32 = arith.constant 0 : i32
    %c0_i32_0 = arith.constant 0 : i32
    %c0_i32_1 = arith.constant 0 : i32
    return %c0_i32, %c0_i32_0 : i32, i32
  }
  func.func @transform_4(%arg0: i32) -> (i32, i32) {
    %c0_i32 = arith.constant 0 : i32
    %c0_i32_0 = arith.constant 0 : i32
    %c0_i32_1 = arith.constant 0 : i32
    return %c0_i32, %c0_i32_0 : i32, i32
  }
  func.func @transform_5(%arg0: i32) -> (i32, i32) {
    %c0_i32 = arith.constant 0 : i32
    %c0_i32_0 = arith.constant 0 : i32
    %c0_i32_1 = arith.constant 0 : i32
    return %c0_i32, %c0_i32_0 : i32, i32
  }
  func.func @transform_6(%arg0: i32) -> (i32, i32, i32) {
    %c0_i32 = arith.constant 0 : i32
    %c0_i32_0 = arith.constant 0 : i32
    %c0_i32_1 = arith.constant 0 : i32
    return %arg0, %c0_i32, %c0_i32_0 : i32, i32, i32
  }
}

</mosaic_0001>

<bundles_post_ra>
// kernel: aspp_forward.1
= control target key start
LH: loop header
LB: loop body
LE: loop exit
PB: predicated region body
PF: predicated region fallthrough
CT: control target
= control target key end

     0   :  { %s1265_s21 = smov 0   ;;  %s1520_s0 = inlined_call_operand.vmem [shape: bf16[2,4,256], index: 0, kind: input, shape index: {}]   ;;  %s1521_s1 = inlined_call_operand.vmem [shape: bf16[2,64,256], index: 1, kind: input, shape index: {}]   ;;  %s1522_s2 = inlined_call_operand.vmem [shape: bf16[40,4], index: 2, kind: input, shape index: {}]   ;;  %s1523_s3 = inlined_call_operand.vmem [shape: bf16[24,64], index: 3, kind: input, shape index: {}]   ;;  %s1524_s4 = inlined_call_operand.vmem [shape: bf16[8,40], index: 4, kind: input, shape index: {}]   ;;  %s1525_s5 = inlined_call_operand.vmem [shape: f32[8,3], index: 5, kind: input, shape index: {}]   ;;  %s1526_s6 = inlined_call_operand.vmem [shape: f32[2,8,256], index: 6, kind: output, shape index: {}]  }
   0x1 LB: > { %s1107_s22 = sadd.s32 4294967295, %s1222_s21   ;;  %p1111_p0 = scmp.ge.s32.totalorder %s1222_s21, 1  ;;  %s1222_s21 = sphi %s1265_s21, %s16_s21  }
   0x2   : > { %p222_p1 = scmp.lt.s32.totalorder %s1222_s21, 3 }
   0x4   : > { %p223_p2 = pnand %p1111_p0, %p222_p1 }
   0x5   : > { %p257_p3 = scmp.lt.s32.totalorder (!%p223_p2), %s1107_s22, 1  ;;  %v1224_v0 = vmov (!%p223_p2), 0   ;;  %vm324_vm0 = vcmask (!%p223_p2), 1041408   ;;  %v1177_v5 = vld [vmem:[%s1522_s2] sm:$0xff] (!%p223_p2)   ;;  %v1192_v6 = vld [vmem:[%s1522_s2 + $0x10] ss:$0 sps:$4 sm:$0xff] (!%p223_p2)  }
   0x6   : > { %226 = sbr.rel (%p223_p2) target bundleno = 1178 (0x49a), region = 44  ;;  %363 = vmatprep.mubr.bf16.mxu0 (!%p223_p2), %v1224_v0  ;;  %383 = vmatprep.mubr.bf16.mxu1 (!%p223_p2), %v1224_v0  ;;  %vm314_vm1 = vcmask (!%p223_p2), 31744   ;;  %v1184_v11 = vld [vmem:[%s1522_s2 + $0x8] sm:$0xff] (!%p223_p2)   ;;  %v1191_v15 = vld [vmem:[%s1523_s3] sm:$0xff] (!%p223_p2)   ;;  %vm444_vm2 = vcmask (!%p223_p2), 523264   ;;  %vm543_vm3 = vcmask (!%p223_p2), 1047556  }
   0x7   : > { %1174 = vset.pattern.permute.xlu0 (!%p223_p2), %v1224_v0  ;;  %v1193_v16 = vld [vmem:[%s1523_s3 + $0x8] ss:$0 sps:$4 sm:$0xff] (!%p223_p2)   ;;  %vm508_vm4 = vcmask (!%p223_p2), 1043456   ;;  %v1358_v60 = vld [vmem:[%s1524_s4] sm:$0xf] (!%p223_p2)  ;;  %s1225_s19 = smov (!%p223_p2), 96  }
   0x8   : > { %v870_v61 = vunpack.c.l.bf16 (!%p223_p2), %v1358_v60  ;;  %v1226_v62 = vmov (!%p223_p2), 0.0   ;;  %vm1227_vm5 = vmmov (!%p223_p2), 0   ;;  %vm874_vm6 = vcmask (!%p223_p2), 64512  }
   0x9   : > { %vm952_vm7 = vcmask (!%p223_p2), 261120  }
   0xd   : > { %s1528_s22 = smov (!%p257_p3, %s1107_s22), 1 }
   0xe   : > { %s1142_s23 = sshll.u32 %s1528_s22, 2  ;;  %s1143_s24 = sshll.u32 %s1528_s22, 6 }
   0xf   : > { %s261_s27 = scalar_lea.vmem %s1520_s0, %s1142_s23  ;;  %s266_s30 = scalar_lea.vmem %s1521_s1, %s1143_s24 }
  0x10   : > { %v1121_v1 = vld.sshfl [vmem:[%s261_s27] sm:$0x33 pattern:$0x76325410]  ;;  %v1180_v4 = vld [vmem:[%s266_s30 + $0x4] ss:$8 sps:$4 sm:$0xff]  }
  0x11   : > { %v313_v2 = vcombine.high %v1121_v1, %v1121_v1  ;;  %v326_v3 = vsel %vm324_vm0, %v1121_v1, 0  ;;  %v1178_v7 = vld [vmem:[%s266_s30] ss:$8 sps:$4 sm:$0xff]   ;;  %v1183_v8 = vld [vmem:[%s266_s30 + $0x14] ss:$8 sps:$4 sm:$0xff]   ;;  %s1144_s24 = sshll.u32 %s1528_s22, 4 }
  0x12   : > { %v1181_v9 = vld [vmem:[%s266_s30 + $0x10] ss:$8 sps:$4 sm:$0xff]   ;;  %v1187_v10 = vld [vmem:[%s266_s30 + $0x24] ss:$8 sps:$4 sm:$0xff]   ;;  %v1185_v12 = vld [vmem:[%s266_s30 + $0x20] ss:$8 sps:$4 sm:$0xff]   ;;  %s271_s27 = scalar_lea.vmem %s1526_s6, %s1144_s24 }
  0x13   : > { %1122 = vmatprep.subr.msk.bf16.mxu0 %vm324_vm0, %v313_v2  ;;  %1152 = vmatprep.subr.msk.bf16.mxu1 %vm324_vm0, %v313_v2  ;;  %v1190_v13 = vld [vmem:[%s266_s30 + $0x34] ss:$8 sps:$4 sm:$0xff]   ;;  %v1188_v14 = vld [vmem:[%s266_s30 + $0x30] ss:$8 sps:$4 sm:$0xff]  }
  0x14   : > { %332 = vmatpush1.bf16.msra.mxu0 %v326_v3  ;;  %1153 = vmatpush1.bf16.msra.mxu1 %v326_v3 }
  0x15   : > { %451 = vmatprep.subr.bf16.mxu0 %v1180_v4  ;;  %1147 = vmatprep.subr.mxu1 %v1226_v62 }
  0x17   : > { %1123 = vmatmul.mubr.msk.bf16.vlgmr.msra.gmra.mrb[0].mxu0 %vm314_vm1, %v1177_v5  ;;  %1125 = vmatmul.mubr.msk.bf16.vlgmr.msra.gmra.mrb[0].mxu1 %vm314_vm1, %v1192_v6 }
  0x18   : > { %452 = vmatpush1.bf16.msra.mxu0 %v1178_v7  ;;  %373 = vmatprep.mubr.bf16.mxu0 %v1224_v0 }
  0x19   : > { %453 = vmatprep.subr.bf16.mxu0 %v1183_v8  ;;  %1149 = vmatprep.mubr.msk.f32.mxu1 %vm1227_vm5, %v1226_v62 }
  0x1c   : > { %454 = vmatpush1.bf16.msra.mxu0 %v1181_v9 }
  0x1d   : > { %455 = vmatprep.subr.bf16.mxu0 %v1187_v10 }
  0x1f   : > { %1124 = vmatmul.mubr.msk.bf16.gmra.mrb[4].mxu0 %vm314_vm1, %v1184_v11 }
  0x20   : > { %456 = vmatpush1.bf16.msra.mxu0 %v1185_v12  ;;  %483 = vmatprep.mubr.bf16.mxu0 %v1224_v0 }
  0x21   : > { %457 = vmatprep.subr.bf16.mxu0 %v1190_v13 }
  0x24   : > { %458 = vmatpush1.bf16.msra.mxu0 %v1188_v14 }
  0x2b   : > { %1136 = vmatmul.mubr.msk.bf16.vlgmr.msra.gmra.mrb[4].mxu0 %vm444_vm2, %v1191_v15 }
  0x2c   : > { %493 = vmatprep.mubr.bf16.mxu0 %v1224_v0 }
  0x33   : > { %1137 = vmatmul.mubr.msk.bf16.gmra.mrb[8].mxu0 %vm444_vm2, %v1193_v16 }
  0xea   : > { %v1307_v17 = vpop.f32.mrb[0].mxu0  ;;  %v385_v18 = vpop.f32.mrb[0].mxu1 }
  0xeb   : > { %v1309_v19 = vpop.f32.mrb[1].mxu0  ;;  %v544_v20 = vsel %vm543_vm3, %v1307_v17, 0.0  ;;  %v509_v21 = vsel %vm508_vm4, %v1307_v17, 0.0  ;;  %v387_v22 = vpop.f32.mrb[1].mxu1 }
  0xec   : > { %v369_v23 = vpop.f32.mrb[2].mxu0  ;;  %v545_v24 = vsel %vm543_vm3, %v1309_v19, 0.0  ;;  %v510_v25 = vsel %vm508_vm4, %v1309_v19, 0.0  ;;  %v389_v26 = vpop.f32.mrb[2].mxu1 }
  0xed   : > { %v371_v27 = vpop.f32.mrb[3].mxu0  ;;  %v546_v28 = vadd.f32 %v545_v24, %v544_v20  ;;  %v511_v29 = vadd.f32 %v510_v25, %v509_v21  ;;  %v390_v30 = vpop.f32.mrb[3].mxu1 }
  0xee   : > { %v392_v31 = vadd.f32 %v371_v27, %v369_v23 }
  0xef   : > { %547 = vadd.xlane.f32.xlu0 %v546_v28  ;;  %512 = vadd.xlane.f32.xlu1 %v511_v29 }
  0xfe   : > { %v1319_v32 = vpop.f32.mrb[4].mxu0 }
  0xff   : > { %v1321_v33 = vpop.f32.mrb[5].mxu0  ;;  %v620_v34 = vsel %vm543_vm3, %v1319_v32, 0.0  ;;  %v586_v35 = vsel %vm508_vm4, %v1319_v32, 0.0 }
 0x100   : > { %v1327_v36 = vpop.f32.mrb[6].mxu0  ;;  %v621_v37 = vsel %vm543_vm3, %v1321_v33, 0.0  ;;  %v587_v38 = vsel %vm508_vm4, %v1321_v33, 0.0 }
 0x101   : > { %v1333_v39 = vpop.f32.mrb[7].mxu0  ;;  %v622_v40 = vadd.f32 %v621_v37, %v620_v34  ;;  %v588_v41 = vadd.f32 %v587_v38, %v586_v35  ;;  %v696_v42 = vsel %vm543_vm3, %v1327_v36, 0.0  ;;  %v662_v43 = vsel %vm508_vm4, %v1327_v36, 0.0 }
 0x102   : > { %v697_v44 = vsel %vm543_vm3, %v1333_v39, 0.0  ;;  %v663_v45 = vsel %vm508_vm4, %v1333_v39, 0.0 }
 0x103   : > { %623 = vadd.xlane.f32.xlu0 %v622_v40  ;;  %589 = vadd.xlane.f32.xlu1 %v588_v41  ;;  %v698_v46 = vadd.f32 %v697_v44, %v696_v42  ;;  %v664_v47 = vadd.f32 %v663_v45, %v662_v43 }
 0x106   : > { %v495_v48 = vpop.f32.mrb[8].mxu0 }
 0x107   : > { %v1343_v49 = vadd.f32 %v495_v48, %v385_v18  ;;  %699 = vadd.xlane.f32.xlu0 %v698_v46  ;;  %v497_v50 = vpop.f32.mrb[9].mxu0 }
 0x108   : > { %v1345_v51 = vadd.f32 %v497_v50, %v387_v22  ;;  %v499_v52 = vpop.f32.mrb[10].mxu0 }
 0x109   : > { %v500_v53 = vpop.f32.mrb[11].mxu0  ;;  %v772_v54 = vsel %vm543_vm3, %v1343_v49, 0.0  ;;  %v738_v57 = vsel %vm508_vm4, %v1343_v49, 0.0 }
 0x10a   : > { %v773_v55 = vsel %vm543_vm3, %v1345_v51, 0.0  ;;  %v739_v58 = vsel %vm508_vm4, %v1345_v51, 0.0 }
 0x10b   : > { %665 = vadd.xlane.f32.xlu0 %v664_v47  ;;  %v774_v56 = vadd.f32 %v773_v55, %v772_v54  ;;  %v740_v59 = vadd.f32 %v739_v58, %v738_v57 }
 0x10d   : > { %775 = vadd.xlane.f32.xlu1 %v774_v56 }
 0x10f   : > { %393 = vadd.xlane.f32.xlu0 %v392_v31 }
 0x111   : > { %741 = vadd.xlane.f32.xlu1 %v740_v59 }
 0x122   : > { %872 = vrot.lane.b32.xlu1 %v870_v61, %s1225_s19 }
 0x17c   : > { %v548_v63 = vpop.xlane.xlu0 %547  ;;  %v513_v1 = vpop.xlane.xlu1 %512 }
 0x17d   : > { %v550_v2 = vrot.slane %v548_v63, 4  ;;  %v514_v3 = vsel %vm508_vm4, %v513_v1, 0.0 }
 0x17e   : > { %v515_v4 = vrot.slane %v514_v3, 4 }
 0x17f   : > { %v552_v5 = vsel %vm508_vm4, %v550_v2, 0.0 }
 0x180   : > { %v553_v6 = vrot.slane %v552_v5, 4  ;;  %v516_v7 = vadd.f32 %v515_v4, %v514_v3 }
 0x182   : > { %v554_v8 = vadd.f32 %v553_v6, %v552_v5  ;;  %v517_v9 = vrot.slane %v516_v7, 2 }
 0x184   : > { %v555_v10 = vrot.slane %v554_v8, 2  ;;  %v518_v11 = vadd.f32 %v517_v9, %v516_v7 }
 0x186   : > { %v556_v12 = vadd.f32 %v555_v10, %v554_v8  ;;  %v519_v13 = vrot.slane %v518_v11, 1 }
 0x188   : > { %v557_v14 = vrot.slane %v556_v12, 1  ;;  %v520_v15 = vadd.f32 %v519_v13, %v518_v11 }
 0x18a   : > { %v558_v16 = vadd.f32 %v557_v14, %v556_v12  ;;  %v521_v18 = vmul.f32 0.0009765625, %v520_v15 }
 0x18c   : > { %v559_v20 = vmul.f32 0.0009765625, %v558_v16  ;;  %v1364_v21 = vsub.f32 %v1307_v17, %v521_v18  ;;  %v1367_v22 = vsub.f32 %v1309_v19, %v521_v18 }
 0x18e   : > { %v524_v23 = vmul.f32 %v1364_v21, %v1364_v21  ;;  %v525_v24 = vmul.f32 %v1367_v22, %v1367_v22  ;;  %v1374_v25 = vsub.f32 %v1307_v17, %v559_v20  ;;  %v1377_v26 = vsub.f32 %v1309_v19, %v559_v20 }
 0x190   : > { %v624_v27 = vpop.xlane.xlu0 %623  ;;  %v590_v28 = vpop.xlane.xlu1 %589  ;;  %v526_v29 = vsel %vm508_vm4, %v524_v23, 0.0  ;;  %v527_v30 = vsel %vm508_vm4, %v525_v24, 0.0  ;;  %v562_v31 = vmul.f32 %v1374_v25, %v1374_v25  ;;  %v563_v34 = vmul.f32 %v1377_v26, %v1377_v26 }
 0x191   : > { %v626_v35 = vrot.slane %v624_v27, 4  ;;  %v591_v37 = vsel %vm508_vm4, %v590_v28, 0.0  ;;  %v528_v17 = vadd.f32 %v527_v30, %v526_v29 }
 0x192   : > { %v592_v38 = vrot.slane %v591_v37, 4  ;;  %v564_v19 = vsel %vm543_vm3, %v562_v31, 0.0  ;;  %v565_v40 = vsel %vm543_vm3, %v563_v34, 0.0 }
 0x193   : > { %v628_v41 = vsel %vm508_vm4, %v626_v35, 0.0  ;;  %529 = vadd.xlane.f32.xlu0 %v528_v17  ;;  %v566_v46 = vadd.f32 %v565_v40, %v564_v19 }
 0x194   : > { %v629_v42 = vrot.slane %v628_v41, 4  ;;  %v593_v43 = vadd.f32 %v592_v38, %v591_v37  ;;  %v700_v44 = vpop.xlane.xlu0 %699 }
 0x195   : > { %v702_v45 = vrot.slane %v700_v44, 4 }
 0x196   : > { %v630_v47 = vadd.f32 %v629_v42, %v628_v41  ;;  %v594_v48 = vrot.slane %v593_v43, 2 }
 0x197   : > { %v704_v50 = vsel %vm508_vm4, %v702_v45, 0.0  ;;  %567 = vadd.xlane.f32.xlu0 %v566_v46 }
 0x198   : > { %v631_v52 = vrot.slane %v630_v47, 2  ;;  %v595_v53 = vadd.f32 %v594_v48, %v593_v43  ;;  %v705_v54 = vrot.slane %v704_v50, 4  ;;  %v666_v55 = vpop.xlane.xlu0 %665 }
 0x199   : > { %v667_v56 = vsel %vm508_vm4, %v666_v55, 0.0 }
 0x19a   : > { %v632_v57 = vadd.f32 %v631_v52, %v630_v47  ;;  %v596_v58 = vrot.slane %v595_v53, 1  ;;  %v706_v59 = vadd.f32 %v705_v54, %v704_v50  ;;  %v668_v61 = vrot.slane %v667_v56, 4  ;;  %v776_v62 = vpop.xlane.xlu1 %775 }
 0x19b   : > { %v778_v63 = vrot.slane %v776_v62, 4 }
 0x19c   : > { %v633_v1 = vrot.slane %v632_v57, 1  ;;  %v597_v2 = vadd.f32 %v596_v58, %v595_v53  ;;  %v707_v3 = vrot.slane %v706_v59, 2  ;;  %v669_v4 = vadd.f32 %v668_v61, %v667_v56  ;;  %v394_v5 = vpop.xlane.xlu0 %393 }
 0x19d   : > { %v780_v6 = vsel %vm508_vm4, %v778_v63, 0.0  ;;  %v1392_v7 = vmul.f32 0.00390625, %v394_v5 }
 0x19e   : > { %v634_v8 = vadd.f32 %v633_v1, %v632_v57  ;;  %v598_v9 = vmul.f32 0.0009765625, %v597_v2  ;;  %v708_v10 = vadd.f32 %v707_v3, %v706_v59  ;;  %v670_v11 = vrot.slane %v669_v4, 2  ;;  %v742_v12 = vpop.xlane.xlu1 %741 }
 0x19f   : > { %v781_v13 = vrot.slane %v780_v6, 4  ;;  %v815_v14 = vsel %vm508_vm4, %v1392_v7, 0.0  ;;  %v838_v15 = vrot.slane %v1392_v7, 4  ;;  %v743_v16 = vsel %vm508_vm4, %v742_v12, 0.0 }
 0x1a0   : > { %v635_v18 = vmul.f32 0.0009765625, %v634_v8  ;;  %v709_v20 = vrot.slane %v708_v10, 1  ;;  %v671_v23 = vadd.f32 %v670_v11, %v669_v4  ;;  %v816_v24 = vrot.slane %v815_v14, 4 }
 0x1a1   : > { %v782_v27 = vadd.f32 %v781_v13, %v780_v6  ;;  %v840_v28 = vsel %vm508_vm4, %v838_v15, 0.0  ;;  %v744_v29 = vrot.slane %v743_v16, 4  ;;  %v1400_v30 = vsub.f32 %v1319_v32, %v598_v9 }
 0x1a2   : > { %v710_v31 = vadd.f32 %v709_v20, %v708_v10  ;;  %v672_v34 = vrot.slane %v671_v23, 1  ;;  %v817_v35 = vadd.f32 %v816_v24, %v815_v14  ;;  %v841_v37 = vrot.slane %v840_v28, 4 }
 0x1a3   : > { %v783_v17 = vrot.slane %v782_v27, 2  ;;  %v745_v38 = vadd.f32 %v744_v29, %v743_v16  ;;  %v1403_v19 = vsub.f32 %v1321_v33, %v598_v9  ;;  %v601_v40 = vmul.f32 %v1400_v30, %v1400_v30 }
 0x1a4   : > { %v711_v41 = vmul.f32 0.0009765625, %v710_v31  ;;  %v673_v42 = vadd.f32 %v672_v34, %v671_v23  ;;  %v818_v43 = vrot.slane %v817_v35, 2  ;;  %v842_v44 = vadd.f32 %v841_v37, %v840_v28 }
 0x1a5   : > { %v784_v45 = vadd.f32 %v783_v17, %v782_v27  ;;  %v746_v46 = vrot.slane %v745_v38, 2  ;;  %v602_v47 = vmul.f32 %v1403_v19, %v1403_v19  ;;  %v603_v48 = vsel %vm508_vm4, %v601_v40, 0.0 }
 0x1a6   : > { %v674_v50 = vmul.f32 0.0009765625, %v673_v42  ;;  %v819_v52 = vadd.f32 %v818_v43, %v817_v35  ;;  %v843_v53 = vrot.slane %v842_v44, 2  ;;  %v1411_v54 = vsub.f32 %v1319_v32, %v635_v18 }
 0x1a7   : > { %v785_v55 = vrot.slane %v784_v45, 1  ;;  %v747_v56 = vadd.f32 %v746_v46, %v745_v38  ;;  %v604_v57 = vsel %vm508_vm4, %v602_v47, 0.0  ;;  %v1415_v58 = vsub.f32 %v1321_v33, %v635_v18 }
 0x1a8   : > { %v820_v59 = vrot.slane %v819_v52, 1  ;;  %v844_v61 = vadd.f32 %v843_v53, %v842_v44  ;;  %v605_v62 = vadd.f32 %v604_v57, %v603_v48  ;;  %v638_v63 = vmul.f32 %v1411_v54, %v1411_v54 }
 0x1a9   : > { %v786_v1 = vadd.f32 %v785_v55, %v784_v45  ;;  %v748_v2 = vrot.slane %v747_v56, 1  ;;  %v639_v3 = vmul.f32 %v1415_v58, %v1415_v58  ;;  %v1422_v32 = vsub.f32 %v1327_v36, %v711_v41 }
 0x1aa   : > { %v821_v4 = vadd.f32 %v820_v59, %v819_v52  ;;  %v845_v5 = vrot.slane %v844_v61, 1  ;;  %606 = vadd.xlane.f32.xlu0 %v605_v62  ;;  %v640_v33 = vsel %vm543_vm3, %v638_v63, 0.0  ;;  %v1426_v6 = vsub.f32 %v1333_v39, %v711_v41 }
 0x1ab   : > { %v787_v8 = vmul.f32 0.0009765625, %v786_v1  ;;  %v749_v9 = vadd.f32 %v748_v2, %v747_v56  ;;  %v641_v10 = vsel %vm543_vm3, %v639_v3, 0.0  ;;  %v714_v11 = vmul.f32 %v1422_v32, %v1422_v32 }
 0x1ac   : > { %v822_v12 = vmul.f32 0.25, %v821_v4  ;;  %v846_v13 = vadd.f32 %v845_v5, %v844_v61  ;;  %v642_v14 = vadd.f32 %v641_v10, %v640_v33  ;;  %v715_v15 = vmul.f32 %v1426_v6, %v1426_v6 }
 0x1ad   : > { %v750_v16 = vmul.f32 0.0009765625, %v749_v9  ;;  %v716_v18 = vsel %vm543_vm3, %v714_v11, 0.0  ;;  %v1435_v20 = vsub.f32 %v1327_v36, %v674_v50  ;;  %v1438_v23 = vsub.f32 %v1333_v39, %v674_v50 }
 0x1ae   : > { %v823_v24 = vsub.f32 %v1392_v7, %v822_v12  ;;  %v847_v27 = vmul.f32 0.25, %v846_v13  ;;  %643 = vadd.xlane.f32.xlu0 %v642_v14  ;;  %v717_v28 = vsel %vm543_vm3, %v715_v15, 0.0  ;;  %v1443_v29 = vsub.f32 %v1343_v49, %v787_v8 }
 0x1af   : > { %v718_v31 = vadd.f32 %v717_v28, %v716_v18  ;;  %v677_v34 = vmul.f32 %v1435_v20, %v1435_v20  ;;  %v678_v36 = vmul.f32 %v1438_v23, %v1438_v23  ;;  %v1450_v35 = vsub.f32 %v1345_v51, %v787_v8  ;;  %v873_v18 = vpop.permute.xlu1 %872 }
 0x1b0   : > { %v824_v39 = vmul.f32 %v823_v24, %v823_v24  ;;  %v848_v37 = vsub.f32 %v1392_v7, %v847_v27  ;;  %v790_v17 = vmul.f32 %v1443_v29, %v1443_v29  ;;  %v1456_v38 = vsub.f32 %v1343_v49, %v750_v16 }
 0x1b1   : > { %719 = vadd.xlane.f32.xlu1 %v718_v31  ;;  %v679_v40 = vsel %vm508_vm4, %v677_v34, 0.0  ;;  %v680_v41 = vsel %vm508_vm4, %v678_v36, 0.0  ;;  %v791_v42 = vmul.f32 %v1450_v35, %v1450_v35  ;;  %v1463_v43 = vsub.f32 %v1345_v51, %v750_v16 }
 0x1b2   : > { %v826_v44 = vsel %vm508_vm4, %v824_v39, 0.0  ;;  %v849_v7 = vmul.f32 %v848_v37, %v848_v37  ;;  %v681_v45 = vadd.f32 %v680_v41, %v679_v40  ;;  %v792_v46 = vsel %vm543_vm3, %v790_v17, 0.0 }
 0x1b3   : > { %v827_v47 = vrot.slane %v826_v44, 4  ;;  %v793_v49 = vsel %vm543_vm3, %v791_v42, 0.0  ;;  %v753_v48 = vmul.f32 %v1456_v38, %v1456_v38  ;;  %v754_v50 = vmul.f32 %v1463_v43, %v1463_v43 }
 0x1b4   : > { %v852_v52 = vrot.slane %v849_v7, 4  ;;  %682 = vadd.xlane.f32.xlu0 %v681_v45  ;;  %v794_v53 = vadd.f32 %v793_v49, %v792_v46 }
 0x1b5   : > { %v828_v51 = vadd.f32 %v827_v47, %v826_v44  ;;  %v755_v59 = vsel %vm508_vm4, %v753_v48, 0.0  ;;  %v756_v61 = vsel %vm508_vm4, %v754_v50, 0.0 }
 0x1b6   : > { %v854_v55 = vsel %vm508_vm4, %v852_v52, 0.0  ;;  %v757_v1 = vadd.f32 %v756_v61, %v755_v59 }
 0x1b7   : > { %v829_v56 = vrot.slane %v828_v51, 2  ;;  %v855_v57 = vrot.slane %v854_v55, 4 }
 0x1b8   : > { %795 = vadd.xlane.f32.xlu0 %v794_v53 }
 0x1b9   : > { %v830_v62 = vadd.f32 %v829_v56, %v828_v51  ;;  %v856_v63 = vadd.f32 %v855_v57, %v854_v55 }
 0x1bb   : > { %v831_v2 = vrot.slane %v830_v62, 1  ;;  %v857_v3 = vrot.slane %v856_v63, 2 }
 0x1bc   : > { %758 = vadd.xlane.f32.xlu0 %v757_v1 }
 0x1bd   : > { %v832_v4 = vadd.f32 %v831_v2, %v830_v62  ;;  %v858_v5 = vadd.f32 %v857_v3, %v856_v63 }
 0x1bf   : > { %v833_v33 = vmul.f32 0.25, %v832_v4  ;;  %v859_v8 = vrot.slane %v858_v5, 1 }
 0x1c1   : > { %v834_v9 = vadd.f32 1e-05, %v833_v33  ;;  %v860_v10 = vadd.f32 %v859_v8, %v858_v5 }
 0x1c3   : > { %v861_v11 = vmul.f32 0.25, %v860_v10  ;;  %1194 = vrsqrt.f32 %v834_v9 }
 0x1c5   : > { %v862_v12 = vadd.f32 1e-05, %v861_v11 }
 0x1c7   : > { %1196 = vrsqrt.f32 %v862_v12 }
 0x1cd   : > { %v1195_v13 = vpop.eup %1194 }
 0x1ce   : > { %v836_v15 = vmul.f32 %v1195_v13, %v823_v24 }
 0x1d1   : > { %v1197_v14 = vpop.eup %1196 }
 0x1d2   : > { %v864_v16 = vmul.f32 %v1197_v14, %v848_v37 }
 0x1d4   : > { %v865_v27 = vsel %vm508_vm4, %v836_v15, %v864_v16 }
 0x1d5   : > { %1148 = vmatpush3.msra.mxu1 %v865_v27 }
 0x1d6   : > { %1150 = vmatmul.mubr.msk.f32.vlgmr.msra.gmra.mrb[4].mxu1 %vm874_vm6, %v873_v18 }
 0x1d7   : > { %988 = vmatprep.mubr.bf16.mxu1 %v1224_v0 }
 0x220   : > { %v530_v28 = vpop.xlane.xlu0 %529 }
 0x221   : > { %v531_v36 = vsel %vm508_vm4, %v530_v28, 0.0 }
 0x222   : > { %v532_v17 = vrot.slane %v531_v36, 4 }
 0x224   : > { %v568_v31 = vpop.xlane.xlu0 %567  ;;  %v533_v41 = vadd.f32 %v532_v17, %v531_v36 }
 0x225   : > { %v570_v34 = vrot.slane %v568_v31, 4 }
 0x226   : > { %v534_v37 = vrot.slane %v533_v41, 2 }
 0x227   : > { %v572_v39 = vsel %vm508_vm4, %v570_v34, 0.0 }
 0x228   : > { %v573_v40 = vrot.slane %v572_v39, 4  ;;  %v535_v44 = vadd.f32 %v534_v37, %v533_v41 }
 0x22a   : > { %v574_v24 = vadd.f32 %v573_v40, %v572_v39  ;;  %v536_v47 = vrot.slane %v535_v44, 1 }
 0x22c   : > { %v575_v42 = vrot.slane %v574_v24, 2  ;;  %v537_v53 = vadd.f32 %v536_v47, %v535_v44 }
 0x22e   : > { %v576_v7 = vadd.f32 %v575_v42, %v574_v24  ;;  %v538_v63 = vmul.f32 0.0009765625, %v537_v53 }
 0x230   : > { %v577_v49 = vrot.slane %v576_v7, 1  ;;  %v539_v13 = vadd.f32 1e-05, %v538_v63 }
 0x232   : > { %v578_v55 = vadd.f32 %v577_v49, %v576_v7  ;;  %1198 = vrsqrt.f32 %v539_v13 }
 0x234   : > { %v579_v5 = vmul.f32 0.0009765625, %v578_v55 }
 0x236   : > { %v580_v27 = vadd.f32 1e-05, %v579_v5 }
 0x237   : > { %v607_v45 = vpop.xlane.xlu0 %606 }
 0x238   : > { %v608_v46 = vsel %vm508_vm4, %v607_v45, 0.0  ;;  %1200 = vrsqrt.f32 %v580_v27 }
 0x239   : > { %v609_v0 = vrot.slane %v608_v46, 4 }
 0x23b   : > { %v610_v48 = vadd.f32 %v609_v0, %v608_v46  ;;  %v644_v50 = vpop.xlane.xlu0 %643 }
 0x23c   : > { %v646_v52 = vrot.slane %v644_v50, 4  ;;  %v1199_v63 = vpop.eup %1198 }
 0x23d   : > { %v611_v51 = vrot.slane %v610_v48, 2 }
 0x23e   : > { %v648_v56 = vsel %vm508_vm4, %v646_v52, 0.0  ;;  %v720_v57 = vpop.xlane.xlu1 %719 }
 0x23f   : > { %v612_v59 = vadd.f32 %v611_v51, %v610_v48  ;;  %v649_v61 = vrot.slane %v648_v56, 4  ;;  %v722_v62 = vrot.slane %v720_v57, 4 }
 0x241   : > { %v613_v1 = vrot.slane %v612_v59, 1  ;;  %v650_v2 = vadd.f32 %v649_v61, %v648_v56  ;;  %v724_v3 = vsel %vm508_vm4, %v722_v62, 0.0  ;;  %v683_v4 = vpop.xlane.xlu0 %682 }
 0x242   : > { %v725_v33 = vrot.slane %v724_v3, 4  ;;  %v684_v8 = vsel %vm508_vm4, %v683_v4, 0.0  ;;  %v1201_v4 = vpop.eup %1200 }
 0x243   : > { %v614_v9 = vadd.f32 %v613_v1, %v612_v59  ;;  %v651_v10 = vrot.slane %v650_v2, 2  ;;  %v685_v11 = vrot.slane %v684_v8, 4 }
 0x244   : > { %v726_v12 = vadd.f32 %v725_v33, %v724_v3 }
 0x245   : > { %v615_v14 = vmul.f32 0.0009765625, %v614_v9  ;;  %v652_v15 = vadd.f32 %v651_v10, %v650_v2  ;;  %v686_v16 = vadd.f32 %v685_v11, %v684_v8  ;;  %v796_v18 = vpop.xlane.xlu0 %795  ;;  %v583_v11 = vmul.f32 %v1201_v4, %v1377_v26 }
 0x246   : > { %v727_v28 = vrot.slane %v726_v12, 2  ;;  %v798_v31 = vrot.slane %v796_v18, 4 }
 0x247   : > { %v653_v34 = vrot.slane %v652_v15, 1  ;;  %v687_v36 = vrot.slane %v686_v16, 2  ;;  %v616_v39 = vadd.f32 1e-05, %v615_v14 }
 0x248   : > { %v728_v17 = vadd.f32 %v727_v28, %v726_v12  ;;  %v800_v40 = vsel %vm508_vm4, %v798_v31, 0.0  ;;  %v582_v12 = vmul.f32 %v1201_v4, %v1374_v25 }
 0x249   : > { %v654_v41 = vadd.f32 %v653_v34, %v652_v15  ;;  %v688_v24 = vadd.f32 %v687_v36, %v686_v16  ;;  %v801_v37 = vrot.slane %v800_v40, 4  ;;  %v759_v42 = vpop.xlane.xlu0 %758  ;;  %1202 = vrsqrt.f32 %v616_v39 }
 0x24a   : > { %v729_v44 = vrot.slane %v728_v17, 1  ;;  %v760_v7 = vsel %vm508_vm4, %v759_v42, 0.0  ;;  %v542_v15 = vmul.f32 %v1199_v63, %v1367_v22  ;;  %v541_v16 = vmul.f32 %v1199_v63, %v1364_v21 }
 0x24b   : > { %v655_v45 = vmul.f32 0.0009765625, %v654_v41  ;;  %v689_v46 = vrot.slane %v688_v24, 1  ;;  %v802_v47 = vadd.f32 %v801_v37, %v800_v40  ;;  %v761_v0 = vrot.slane %v760_v7, 4 }
 0x24c   : > { %v730_v49 = vadd.f32 %v729_v44, %v728_v17  ;;  %v585_v26 = vsel %vm508_vm4, %v542_v15, %v583_v11  ;;  %v584_v34 = vsel %vm508_vm4, %v541_v16, %v582_v12 }
 0x24d   : > { %v656_v48 = vadd.f32 1e-05, %v655_v45  ;;  %v690_v50 = vadd.f32 %v689_v46, %v688_v24  ;;  %v803_v52 = vrot.slane %v802_v47, 2  ;;  %v762_v53 = vadd.f32 %v761_v0, %v760_v7 }
 0x24e   : > { %v731_v51 = vmul.f32 0.0009765625, %v730_v49 }
 0x24f   : > { %1204 = vrsqrt.f32 %v656_v48  ;;  %v691_v55 = vmul.f32 0.0009765625, %v690_v50  ;;  %v804_v56 = vadd.f32 %v803_v52, %v802_v47  ;;  %v763_v57 = vrot.slane %v762_v53, 2 }
 0x250   : > { %v732_v62 = vadd.f32 1e-05, %v731_v51  ;;  %v1228_v51 = vmov 1  }
 0x251   : > { %v805_v59 = vrot.slane %v804_v56, 1  ;;  %v764_v61 = vadd.f32 %v763_v57, %v762_v53  ;;  %v692_v1 = vadd.f32 1e-05, %v691_v55  ;;  %1175 = vset.pattern.permute.xlu1 %v1228_v51 }
 0x252   : > { %1206 = vrsqrt.f32 %v732_v62 }
 0x253   : > { %v806_v2 = vadd.f32 %v805_v59, %v804_v56  ;;  %v765_v3 = vrot.slane %v764_v61, 1  ;;  %v1203_v8 = vpop.eup %1202  ;;  %1208 = vrsqrt.f32 %v692_v1 }
 0x254   : > { %v619_v18 = vmul.f32 %v1203_v8, %v1403_v19  ;;  %v618_v28 = vmul.f32 %v1203_v8, %v1400_v30 }
 0x255   : > { %v807_v5 = vmul.f32 0.0009765625, %v806_v2  ;;  %v766_v33 = vadd.f32 %v765_v3, %v764_v61 }
 0x257   : > { %v808_v9 = vadd.f32 1e-05, %v807_v5  ;;  %v767_v10 = vmul.f32 0.0009765625, %v766_v33 }
 0x259   : > { %v1205_v13 = vpop.eup %1204  ;;  %1210 = vrsqrt.f32 %v808_v9  ;;  %v768_v14 = vadd.f32 1e-05, %v767_v10 }
 0x25a   : > { %v659_v27 = vmul.f32 %v1205_v13, %v1415_v58  ;;  %v658_v31 = vmul.f32 %v1205_v13, %v1411_v54 }
 0x25b   : > { %1212 = vrsqrt.f32 %v768_v14 }
 0x25c   : > { %v661_v25 = vsel %vm508_vm4, %v619_v18, %v659_v27  ;;  %v660_v36 = vsel %vm508_vm4, %v618_v28, %v658_v31  ;;  %v1207_v21 = vpop.eup %1206 }
 0x25d   : > { %v867_v22 = vpack.c.bf16 %v661_v25, %v585_v26  ;;  %v866_v39 = vpack.c.bf16 %v660_v36, %v584_v34  ;;  %v1209_v19 = vpop.eup %1208  ;;  %v735_v54 = vmul.f32 %v1207_v21, %v1426_v6  ;;  %v734_v40 = vmul.f32 %v1207_v21, %v1422_v32  ;;  %v291_v32 = vld [vmem:[%s1525_s5] sm:$0xff] }
 0x25e   : > { %v695_v30 = vmul.f32 %v1209_v19, %v1438_v23  ;;  %v694_v17 = vmul.f32 %v1209_v19, %v1435_v20 }
 0x25f   : > { %956 = vmatprep.subr.bf16.mxu1 %v867_v22 }
 0x260   : > { %957 = vmatpush1.bf16.msra.mxu1 %v866_v39  ;;  %v737_v7 = vsel %vm508_vm4, %v695_v30, %v735_v54  ;;  %v736_v23 = vsel %vm508_vm4, %v694_v17, %v734_v40 }
 0x263   : > { %v1211_v58 = vpop.eup %1210 }
 0x264   : > { %v811_v37 = vmul.f32 %v1211_v58, %v1450_v35  ;;  %v810_v44 = vmul.f32 %v1211_v58, %v1443_v29 }
 0x265   : > { %v1213_v41 = vpop.eup %1212 }
 0x266   : > { %v771_v24 = vmul.f32 %v1213_v41, %v1463_v43  ;;  %v770_v42 = vmul.f32 %v1213_v41, %v1456_v38 }
 0x268   : > { %v813_v45 = vsel %vm508_vm4, %v771_v24, %v811_v37  ;;  %v812_v6 = vsel %vm508_vm4, %v770_v42, %v810_v44 }
 0x269   : > { %v869_v20 = vpack.c.bf16 %v813_v45, %v737_v7  ;;  %v868_v46 = vpack.c.bf16 %v812_v6, %v736_v23 }
 0x26b   : > { %958 = vmatprep.subr.bf16.mxu1 %v869_v20 }
 0x26c   : > { %959 = vmatpush1.bf16.msra.mxu1 %v868_v46 }
 0x26f   : > { %1139 = vmatmul.mubr.msk.bf16.vlgmr.msra.gmra.mrb[8].mxu1 %vm952_vm7, %v1358_v60  ;;  %v1229_v60 = vmov 2  }
 0x2a9   : > { %v943_v29 = vpop.f32.mrb[4].mxu1 }
 0x2aa   : > { %v944_v35 = vadd.f32 %v943_v29, %v291_v32  ;;  %v1151_v38 = vpop.f32.mrb[5].mxu1 }
 0x2ac   : > { %949 = vperm.xlu0 %1174, %v944_v35  }
 0x2b0   : > { %1176 = vset.pattern.permute.xlu0 %v1229_v60 }
 0x2b1   : > { %1033 = vperm.xlu0 %1176, %v291_v32  }
 0x32b   : > { %v950_v43 = vpop.permute.xlu0 %949 }
 0x330   : > { %v1034_v26 = vpop.permute.xlu0 %1033 }
 0x342   : > { %v990_v47 = vpop.f32.mrb[8].mxu1 }
 0x343   : > { %v992_v0 = vpop.f32.mrb[9].mxu1  ;;  %v991_v49 = vadd.f32 %v990_v47, %v950_v43 }
 0x344   : > { %v993_v48 = vadd.f32 %v992_v0, %v950_v43  ;;  %v994_v50 = vpop.f32.mrb[10].mxu1 }
 0x345   : > { %v995_v52 = vpop.f32.mrb[11].mxu1 }
 0x346   : > { %v997_v53 = vadd.f32 %v993_v48, %v991_v49 }
 0x348   : > { %998 = vadd.xlane.f32.xlu1 %v997_v53 }
 0x3d5   : > { %v999_v55 = vpop.xlane.xlu1 %998 }
 0x3d6   : > { %v1000_v56 = vrot.slane %v999_v55, 4 }
 0x3d8   : > { %v1001_v57 = vadd.f32 %v1000_v56, %v999_v55 }
 0x3da   : > { %v1002_v59 = vrot.slane %v1001_v57, 2 }
 0x3dc   : > { %v1003_v61 = vadd.f32 %v1002_v59, %v1001_v57 }
 0x3de   : > { %v1004_v62 = vrot.slane %v1003_v61, 1 }
 0x3e0   : > { %v1005_v63 = vadd.f32 %v1004_v62, %v1003_v61 }
 0x3e2   : > { %v1006_v1 = vmul.f32 0.00048828125, %v1005_v63 }
 0x3e4   : > { %v1007_v2 = vsub.f32 %v991_v49, %v1006_v1  ;;  %v1008_v3 = vsub.f32 %v993_v48, %v1006_v1 }
 0x3e6   : > { %v1009_v4 = vmul.f32 %v1007_v2, %v1007_v2  ;;  %v1010_v5 = vmul.f32 %v1008_v3, %v1008_v3 }
 0x3e8   : > { %v1011_v33 = vadd.f32 %v1010_v5, %v1009_v4 }
 0x3ea   : > { %1012 = vadd.xlane.f32.xlu1 %v1011_v33 }
 0x3fb   : > { %1027 = vperm.xlu1 %1175, %v291_v32  }
 0x477   : > { %v1013_v8 = vpop.xlane.xlu1 %1012 }
 0x478   : > { %v1014_v9 = vrot.slane %v1013_v8, 4 }
 0x47a   : > { %v1015_v10 = vadd.f32 %v1014_v9, %v1013_v8 }
 0x47b   : > { %v1028_v27 = vpop.permute.xlu1 %1027 }
 0x47c   : > { %v1016_v11 = vrot.slane %v1015_v10, 2 }
 0x47e   : > { %v1017_v12 = vadd.f32 %v1016_v11, %v1015_v10 }
 0x480   : > { %v1018_v13 = vrot.slane %v1017_v12, 1 }
 0x482   : > { %v1019_v14 = vadd.f32 %v1018_v13, %v1017_v12 }
 0x484   : > { %v1020_v15 = vmul.f32 0.00048828125, %v1019_v14 }
 0x486   : > { %v1021_v16 = vadd.f32 1e-05, %v1020_v15 }
 0x488   : > { %1214 = vrsqrt.f32 %v1021_v16 }
 0x492   : > { %v1215_v18 = vpop.eup %1214 }
 0x493   : > { %v1023_v28 = vmul.f32 %v1215_v18, %v1007_v2  ;;  %v1024_v31 = vmul.f32 %v1215_v18, %v1008_v3 }
 0x495   : > { %v1030_v25 = vmul.f32 %v1028_v27, %v1023_v28  ;;  %v1031_v34 = vmul.f32 %v1028_v27, %v1024_v31 }
 0x497   : > { %v1036_v36 = vadd.f32 %v1034_v26, %v1030_v25  ;;  %v1037_v22 = vadd.f32 %v1034_v26, %v1031_v34 }
 0x499   : > { %1038 = vst [vmem:[%s271_s27] sm:$0xff] %v1036_v36  ;;  %1039 = vst [vmem:[%s271_s27 + $0x8] sm:$0xff] %v1037_v22 }
 0x49a PF: > { %s16_s21 = sadd.s32 1, %s1222_s21  }
 0x49b   : > { %p13_p4 = scmp.ge.s32.totalorder %s16_s21, 4  }
 0x49d   :  { %15 = sbr.rel (!%p13_p4) target bundleno = 1 (0x1), region = 77 }

</bundles_post_ra>
